<compile_context>
chip_gen: v7x
topology: tpu7x:2x2x1
jax: 0.10.0
libtpu: 0.0.40
codegen_flags: <defaults>
</compile_context>

<pallas_src>
import jax
import jax.numpy as jnp
from jax.experimental import pallas as pl
from jax.experimental.pallas import tpu as pltpu


def text_branch(x, w1, b1, gamma, beta, w2, b2, *, tm_max=1024):
    """x: (B, in_dim) f32.  Returns (B, out_dim) f32, L2-normalized per row."""
    del b1  # fc1 bias is mathematically dead under training-mode BatchNorm.

    B, in_dim = x.shape
    D = w1.shape[1]          # hidden width == BN width
    out_dim = w2.shape[1]

    # Batch tile: whole batch if small, else 1024 rows (multiple of 8; ~85%+ of HBM
    # roofline per the measured tile-size curve, a few MiB of VMEM after lane padding).
    tm = B if B <= tm_max else tm_max
    nbt = pl.cdiv(B, tm)

    # One (3, D) per-feature parameter array -> one DMA instead of three.
    # (Tiny; could also be hoisted to init time by the caller.)
    params = jnp.concatenate([gamma, beta, b2], axis=0)

    def kernel(x_ref, w1_ref, p_ref, w2_ref, o_ref, sum_ref, sq_ref):
        phase = pl.program_id(0)   # 0: full-batch stats pass, 1: apply pass
        i = pl.program_id(1)       # batch tile index

        @pl.when((phase == 0) & (i == 0))
        def _():
            sum_ref[...] = jnp.zeros_like(sum_ref)
            sq_ref[...] = jnp.zeros_like(sq_ref)

        # fc1 Linear (bias omitted: mean subtraction in training-mode BN cancels it).
        h = jnp.dot(x_ref[...], w1_ref[...], preferred_element_type=jnp.float32)

        @pl.when(phase == 0)
        def _():
            # Accumulate full-batch column sum / sum-of-squares; mask rows past B in a
            # partial last tile so garbage rows never enter the statistics.
            row = jax.lax.broadcasted_iota(jnp.int32, h.shape, 0) + i * tm
            hm = jnp.where(row < B, h, 0.0)
            sum_ref[...] += jnp.sum(hm, axis=0, keepdims=True)
            sq_ref[...] += jnp.sum(hm * hm, axis=0, keepdims=True)

        @pl.when(phase == 1)
        def _():
            inv_b = jnp.float32(1.0 / B)
            mean = sum_ref[...] * inv_b                              # (1, D)
            var = jnp.maximum(sq_ref[...] * inv_b - mean * mean, 0.0)
            # gamma folded into scale, beta/mean folded into shift -> single mul+add.
            scale = p_ref[0:1, :] * jax.lax.rsqrt(var + 1e-3)
            shift = p_ref[1:2, :] - mean * scale
            a = jnp.maximum(h * scale + shift, 0.0)                  # BN + ReLU
            y = jnp.dot(a, w2_ref[...],
                        preferred_element_type=jnp.float32) + p_ref[2:3, :]
            # L2 normalize along dim=1, matching torch: y / (||y||_2 + 1e-10).
            norm = jnp.sqrt(jnp.sum(y * y, axis=1, keepdims=True))
            o_ref[...] = y / (norm + 1e-10)

    grid_spec = pltpu.PrefetchScalarGridSpec(
        num_scalar_prefetch=0,
        grid=(2, nbt),
        in_specs=[
            pl.BlockSpec((tm, in_dim), lambda p, i: (i, 0)),      # x: re-read per pass
            pl.BlockSpec((in_dim, D), lambda p, i: (0, 0)),       # w1: VMEM-resident
            pl.BlockSpec((3, D), lambda p, i: (0, 0)),            # gamma/beta/b2
            pl.BlockSpec((D, out_dim), lambda p, i: (0, 0)),      # w2: VMEM-resident
        ],
        # Pinned to block 0 during the stats pass (no writes there), then walks the
        # batch tiles in the apply pass -> each output block written back exactly once.
        out_specs=pl.BlockSpec((tm, out_dim), lambda p, i: (i * p, 0)),
        scratch_shapes=[
            pltpu.VMEM((1, D), jnp.float32),   # column sums
            pltpu.VMEM((1, D), jnp.float32),   # column sums of squares
        ],
    )

    return pl.pallas_call(
        kernel,
        out_shape=jax.ShapeDtypeStruct((B, out_dim), jnp.float32),
        grid_spec=grid_spec,
        compiler_params=pltpu.CompilerParams(
            # Both axes "arbitrary": pass 1 depends on the cross-tile stats accumulator.
            dimension_semantics=("arbitrary", "arbitrary")),
    )(x, w1, params, w2)


def reference(x, w1, b1, gamma, beta, w2, b2):
    # Exact PyTorch-forward semantics (including the fc1 bias, which cancels in BN).
    h = x @ w1 + b1
    mean = jnp.mean(h, axis=0, keepdims=True)
    var = jnp.mean((h - mean) ** 2, axis=0, keepdims=True)   # biased, training mode
    h = (h - mean) / jnp.sqrt(var + 1e-3) * gamma + beta
    h = jnp.maximum(h, 0.0)
    y = h @ w2 + b2
    norm = jnp.linalg.norm(y, axis=1, keepdims=True) + 1e-10
    return y / norm


if __name__ == "__main__":
    input_dim, output_dim, batch = 32, 16, 8

    key = jax.random.PRNGKey(0)
    kx, kw1, kb1, kw2, kb2 = jax.random.split(key, 5)

    x = jax.random.normal(kx, (batch, input_dim), dtype=jnp.float32)

    # Deterministic PyTorch-like uniform fan-in init. Weights stored transposed as
    # (in_features, out_features) so the kernel computes y = x @ W + b.
    bound1 = 1.0 / jnp.sqrt(input_dim)
    w1 = jax.random.uniform(kw1, (input_dim, output_dim), jnp.float32, -bound1, bound1)
    b1 = jax.random.uniform(kb1, (1, output_dim), jnp.float32, -bound1, bound1)
    gamma = jnp.ones((1, output_dim), jnp.float32)   # BatchNorm1d weight
    beta = jnp.zeros((1, output_dim), jnp.float32)   # BatchNorm1d bias
    bound2 = 1.0 / jnp.sqrt(output_dim)
    w2 = jax.random.uniform(kw2, (output_dim, output_dim), jnp.float32, -bound2, bound2)
    b2 = jax.random.uniform(kb2, (1, output_dim), jnp.float32, -bound2, bound2)

    out = text_branch(x, w1, b1, gamma, beta, w2, b2)
    jax.block_until_ready(out)

    ref = reference(x, w1, b1, gamma, beta, w2, b2)
    assert out.shape == (batch, output_dim)
    assert jnp.allclose(out, ref, atol=1e-5, rtol=1e-5), float(jnp.max(jnp.abs(out - ref)))

    print("KERNEL_OK")
</pallas_src>

<mosaic_0001>
module attributes {stable_mosaic.version = 11 : i64} {
  func.func @kernel(%arg0: i32, %arg1: i32, %arg2: memref<8x32xf32, #tpu.memory_space<vmem>>, %arg3: memref<32x16xf32, #tpu.memory_space<vmem>>, %arg4: memref<3x16xf32, #tpu.memory_space<vmem>>, %arg5: memref<16x16xf32, #tpu.memory_space<vmem>>, %arg6: memref<8x16xf32, #tpu.memory_space<vmem>>, %arg7: memref<1x16xf32, #tpu.memory_space<vmem>>, %arg8: memref<1x16xf32, #tpu.memory_space<vmem>>) attributes {dimension_semantics = [#tpu.dimension_semantics<arbitrary>, #tpu.dimension_semantics<arbitrary>], iteration_bounds = array<i64: 2, 1>, scalar_prefetch = 0 : i64, scratch_operands = 2 : i64, tpu.core_type = #tpu.core_type<tc>, window_params = [{transform_indices = @transform_0, window_bounds = array<i64: 8, 32>}, {pipeline_mode = #tpu.pipeline_mode<synchronous>, transform_indices = @transform_1, window_bounds = array<i64: 32, 16>}, {pipeline_mode = #tpu.pipeline_mode<synchronous>, transform_indices = @transform_2, window_bounds = array<i64: 3, 16>}, {pipeline_mode = #tpu.pipeline_mode<synchronous>, transform_indices = @transform_3, window_bounds = array<i64: 16, 16>}, {transform_indices = @transform_4, window_bounds = array<i64: 8, 16>}]} {
    %c0_i32 = arith.constant 0 : i32
    %0 = arith.cmpi eq, %arg0, %c0_i32 : i32
    %c0_i32_0 = arith.constant 0 : i32
    %1 = arith.cmpi eq, %arg1, %c0_i32_0 : i32
    %2 = arith.andi %0, %1 : i1
    %3 = arith.extui %2 : i1 to i32
    %c0_i32_1 = arith.constant 0 : i32
    %4 = arith.cmpi ne, %3, %c0_i32_1 : i32
    scf.if %4 {
      %cst_8 = arith.constant 0.000000e+00 : f32
      %14 = vector.broadcast %cst_8 : f32 to vector<1x16xf32>
      %c0_9 = arith.constant 0 : index
      %c0_10 = arith.constant 0 : index
      %15 = vector.load %arg7[%c0_9, %c0_10] : memref<1x16xf32, #tpu.memory_space<vmem>>, vector<1x16xf32>
      tpu.vector_store %arg7[%c0_9, %c0_10], %14 {strides = array<i32>} : memref<1x16xf32, #tpu.memory_space<vmem>>, vector<1x16xf32>,
      %cst_11 = arith.constant 0.000000e+00 : f32
      %16 = vector.broadcast %cst_11 : f32 to vector<1x16xf32>
      %c0_12 = arith.constant 0 : index
      %c0_13 = arith.constant 0 : index
      %17 = vector.load %arg8[%c0_12, %c0_13] : memref<1x16xf32, #tpu.memory_space<vmem>>, vector<1x16xf32>
      tpu.vector_store %arg8[%c0_12, %c0_13], %16 {strides = array<i32>} : memref<1x16xf32, #tpu.memory_space<vmem>>, vector<1x16xf32>,
    } else {
    }
    %c0 = arith.constant 0 : index
    %c0_2 = arith.constant 0 : index
    %5 = vector.load %arg2[%c0, %c0_2] : memref<8x32xf32, #tpu.memory_space<vmem>>, vector<8x32xf32>
    %c0_3 = arith.constant 0 : index
    %c0_4 = arith.constant 0 : index
    %6 = vector.load %arg3[%c0_3, %c0_4] : memref<32x16xf32, #tpu.memory_space<vmem>>, vector<32x16xf32>
    %cst = arith.constant dense<0.000000e+00> : vector<8x16xf32>
    %7 = tpu.matmul %5, %6, %cst {dimension_numbers = #tpu.dot_dimension_numbers<[1], [0], [0], [1], [0, 0, 1, 1], [], []>} : vector<8x32xf32>, vector<32x16xf32>, vector<8x16xf32> -> vector<8x16xf32>
    %c0_i32_5 = arith.constant 0 : i32
    %8 = arith.cmpi eq, %arg0, %c0_i32_5 : i32
    %9 = arith.extui %8 : i1 to i32
    %c0_i32_6 = arith.constant 0 : i32
    %10 = arith.cmpi ne, %9, %c0_i32_6 : i32
    scf.if %10 {
      %14 = tpu.iota {dimensions = array<i32: 0>} : vector<8x16xi32>
      %c8_i32 = arith.constant 8 : i32
      %15 = arith.muli %arg1, %c8_i32 : i32
      %16 = vector.broadcast %15 : i32 to vector<8x16xi32>
      %17 = arith.addi %14, %16 : vector<8x16xi32>
      %c8_i32_8 = arith.constant 8 : i32
      %18 = vector.broadcast %c8_i32_8 : i32 to vector<8x16xi32>
      %19 = arith.cmpi slt, %17, %18 : vector<8x16xi32>
      %cst_9 = arith.constant 0.000000e+00 : f32
      %20 = vector.broadcast %cst_9 : f32 to vector<8x16xf32>
      %21 = arith.select %19, %7, %20 : vector<8x16xi1>, vector<8x16xf32>
      %c0_10 = arith.constant 0 : index
      %c0_11 = arith.constant 0 : index
      %22 = vector.load %arg7[%c0_10, %c0_11] : memref<1x16xf32, #tpu.memory_space<vmem>>, vector<1x16xf32>
      %cst_12 = arith.constant dense<0.000000e+00> : vector<16xf32>
      %23 = vector.multi_reduction <add>, %21, %cst_12 [0] : vector<8x16xf32> to vector<16xf32>
      %24 = vector.shape_cast %23 : vector<16xf32> to vector<1x16xf32>
      %25 = arith.addf %22, %24 : vector<1x16xf32>
      %c0_13 = arith.constant 0 : index
      %c0_14 = arith.constant 0 : index
      %26 = vector.load %arg7[%c0_13, %c0_14] : memref<1x16xf32, #tpu.memory_space<vmem>>, vector<1x16xf32>
      tpu.vector_store %arg7[%c0_13, %c0_14], %25 {strides = array<i32>} : memref<1x16xf32, #tpu.memory_space<vmem>>, vector<1x16xf32>,
      %c0_15 = arith.constant 0 : index
      %c0_16 = arith.constant 0 : index
      %27 = vector.load %arg8[%c0_15, %c0_16] : memref<1x16xf32, #tpu.memory_space<vmem>>, vector<1x16xf32>
      %28 = arith.mulf %21, %21 : vector<8x16xf32>
      %cst_17 = arith.constant dense<0.000000e+00> : vector<16xf32>
      %29 = vector.multi_reduction <add>, %28, %cst_17 [0] : vector<8x16xf32> to vector<16xf32>
      %30 = vector.shape_cast %29 : vector<16xf32> to vector<1x16xf32>
      %31 = arith.addf %27, %30 : vector<1x16xf32>
      %c0_18 = arith.constant 0 : index
      %c0_19 = arith.constant 0 : index
      %32 = vector.load %arg8[%c0_18, %c0_19] : memref<1x16xf32, #tpu.memory_space<vmem>>, vector<1x16xf32>
      tpu.vector_store %arg8[%c0_18, %c0_19], %31 {strides = array<i32>} : memref<1x16xf32, #tpu.memory_space<vmem>>, vector<1x16xf32>,
    } else {
    }
    %c1_i32 = arith.constant 1 : i32
    %11 = arith.cmpi eq, %arg0, %c1_i32 : i32
    %12 = arith.extui %11 : i1 to i32
    %c0_i32_7 = arith.constant 0 : i32
    %13 = arith.cmpi ne, %12, %c0_i32_7 : i32
    scf.if %13 {
      %c0_8 = arith.constant 0 : index
      %c0_9 = arith.constant 0 : index
      %14 = vector.load %arg7[%c0_8, %c0_9] : memref<1x16xf32, #tpu.memory_space<vmem>>, vector<1x16xf32>
      %cst_10 = arith.constant 1.250000e-01 : f32
      %15 = vector.broadcast %cst_10 : f32 to vector<1x16xf32>
      %16 = arith.mulf %14, %15 : vector<1x16xf32>
      %c0_11 = arith.constant 0 : index
      %c0_12 = arith.constant 0 : index
      %17 = vector.load %arg8[%c0_11, %c0_12] : memref<1x16xf32, #tpu.memory_space<vmem>>, vector<1x16xf32>
      %cst_13 = arith.constant 1.250000e-01 : f32
      %18 = vector.broadcast %cst_13 : f32 to vector<1x16xf32>
      %19 = arith.mulf %17, %18 : vector<1x16xf32>
      %20 = arith.mulf %16, %16 : vector<1x16xf32>
      %21 = arith.subf %19, %20 : vector<1x16xf32>
      %cst_14 = arith.constant 0.000000e+00 : f32
      %22 = vector.broadcast %cst_14 : f32 to vector<1x16xf32>
      %23 = arith.maximumf %21, %22 : vector<1x16xf32>
      %c0_15 = arith.constant 0 : index
      %c0_16 = arith.constant 0 : index
      %24 = vector.load %arg4[%c0_15, %c0_16] : memref<3x16xf32, #tpu.memory_space<vmem>>, vector<1x16xf32>
      %cst_17 = arith.constant 1.000000e-03 : f32
      %25 = vector.broadcast %cst_17 : f32 to vector<1x16xf32>
      %26 = arith.addf %23, %25 : vector<1x16xf32>
      %27 = math.rsqrt %26 : vector<1x16xf32>
      %28 = arith.mulf %24, %27 : vector<1x16xf32>
      %c1 = arith.constant 1 : index
      %c0_18 = arith.constant 0 : index
      %29 = vector.load %arg4[%c1, %c0_18] : memref<3x16xf32, #tpu.memory_space<vmem>>, vector<1x16xf32>
      %30 = arith.mulf %16, %28 : vector<1x16xf32>
      %31 = arith.subf %29, %30 : vector<1x16xf32>
      %32 = vector.broadcast %28 : vector<1x16xf32> to vector<8x16xf32>
      %33 = arith.mulf %7, %32 : vector<8x16xf32>
      %34 = vector.broadcast %31 : vector<1x16xf32> to vector<8x16xf32>
      %35 = arith.addf %33, %34 : vector<8x16xf32>
      %cst_19 = arith.constant 0.000000e+00 : f32
      %36 = vector.broadcast %cst_19 : f32 to vector<8x16xf32>
      %37 = arith.maximumf %35, %36 : vector<8x16xf32>
      %c0_20 = arith.constant 0 : index
      %c0_21 = arith.constant 0 : index
      %38 = vector.load %arg5[%c0_20, %c0_21] : memref<16x16xf32, #tpu.memory_space<vmem>>, vector<16x16xf32>
      %cst_22 = arith.constant dense<0.000000e+00> : vector<8x16xf32>
      %39 = tpu.matmul %37, %38, %cst_22 {dimension_numbers = #tpu.dot_dimension_numbers<[1], [0], [0], [1], [0, 0, 1, 1], [], []>} : vector<8x16xf32>, vector<16x16xf32>, vector<8x16xf32> -> vector<8x16xf32>
      %c2 = arith.constant 2 : index
      %c0_23 = arith.constant 0 : index
      %40 = vector.load %arg4[%c2, %c0_23] : memref<3x16xf32, #tpu.memory_space<vmem>>, vector<1x16xf32>
      %41 = vector.broadcast %40 : vector<1x16xf32> to vector<8x16xf32>
      %42 = arith.addf %39, %41 : vector<8x16xf32>
      %43 = arith.mulf %42, %42 : vector<8x16xf32>
      %cst_24 = arith.constant dense<0.000000e+00> : vector<8xf32>
      %44 = vector.multi_reduction <add>, %43, %cst_24 [1] : vector<8x16xf32> to vector<8xf32>
      %45 = vector.shape_cast %44 : vector<8xf32> to vector<8x1xf32>
      %46 = math.sqrt %45 : vector<8x1xf32>
      %cst_25 = arith.constant 1.000000e-10 : f32
      %47 = vector.broadcast %cst_25 : f32 to vector<8x1xf32>
      %48 = arith.addf %46, %47 : vector<8x1xf32>
      %49 = vector.broadcast %48 : vector<8x1xf32> to vector<8x16xf32>
      %50 = arith.divf %42, %49 : vector<8x16xf32>
      %c0_26 = arith.constant 0 : index
      %c0_27 = arith.constant 0 : index
      %51 = vector.load %arg6[%c0_26, %c0_27] : memref<8x16xf32, #tpu.memory_space<vmem>>, vector<8x16xf32>
      tpu.vector_store %arg6[%c0_26, %c0_27], %50 {strides = array<i32>} : memref<8x16xf32, #tpu.memory_space<vmem>>, vector<8x16xf32>,
    } else {
    }
    return
  }
  func.func @transform_0(%arg0: i32, %arg1: i32) -> (i32, i32) {
    %c0_i32 = arith.constant 0 : i32
    %c0_i32_0 = arith.constant 0 : i32
    return %arg1, %c0_i32 : i32, i32
  }
  func.func @transform_1(%arg0: i32, %arg1: i32) -> (i32, i32) {
    %c0_i32 = arith.constant 0 : i32
    %c0_i32_0 = arith.constant 0 : i32
    %c0_i32_1 = arith.constant 0 : i32
    return %c0_i32, %c0_i32_0 : i32, i32
  }
  func.func @transform_2(%arg0: i32, %arg1: i32) -> (i32, i32) {
    %c0_i32 = arith.constant 0 : i32
    %c0_i32_0 = arith.constant 0 : i32
    %c0_i32_1 = arith.constant 0 : i32
    return %c0_i32, %c0_i32_0 : i32, i32
  }
  func.func @transform_3(%arg0: i32, %arg1: i32) -> (i32, i32) {
    %c0_i32 = arith.constant 0 : i32
    %c0_i32_0 = arith.constant 0 : i32
    %c0_i32_1 = arith.constant 0 : i32
    return %c0_i32, %c0_i32_0 : i32, i32
  }
  func.func @transform_4(%arg0: i32, %arg1: i32) -> (i32, i32) {
    %0 = arith.muli %arg1, %arg0 : i32
    %c0_i32 = arith.constant 0 : i32
    %c0_i32_0 = arith.constant 0 : i32
    return %0, %c0_i32 : i32, i32
  }
}

</mosaic_0001>

<bundles_post_ra>
// kernel: tpu_custom_call.1
= control target key start
LH: loop header
LB: loop body
LE: loop exit
PB: predicated region body
PF: predicated region fallthrough
CT: control target
= control target key end

     0   :  { %9 = vsyncpa [#allocation5], 0  ;;  %s820_s0 = inlined_call_operand.vmem [shape: f32[8,32], index: 0, kind: input, shape index: {}]   ;;  %s821_s1 = inlined_call_operand.vmem [shape: f32[32,16], index: 1, kind: input, shape index: {}]   ;;  %s822_s2 = inlined_call_operand.vmem [shape: f32[3,16], index: 2, kind: input, shape index: {}]   ;;  %s823_s3 = inlined_call_operand.vmem [shape: f32[16,16], index: 3, kind: input, shape index: {}]   ;;  %s824_s4 = inlined_call_operand.hbm [shape: f32[8,16], index: 4, kind: output, shape index: {}]  }
   0x1   :  { %11 = vsyncpa [#allocation5 + $0x1], 0  ;;  %s726_s15 = smov 0   ;;  %s728_s16 = smov 0  }
   0x2   :  { %s730_s17 = smov 0  }
   0x3 LB: > { %s539_s18 = sadd.s32 4294967295, %s691_s17   ;;  %s540_s19 = sadd.s32 4294967294, %s691_s17   ;;  %s691_s17 = sphi %s730_s17, %s17_s17   ;;  %s687_s16 = sphi %s728_s16, %s827_s16   ;;  %s683_s15 = sphi %s726_s15, %s826_s15  }
   0x4   : > { %s29_s20 = sadd.s32 1, %s687_s16  ;;  %p543_p0 = scmp.ge.s32.totalorder %s691_s17, 1 }
   0x5   : > { %p31_p1 = scmp.ge.s32.totalorder %s29_s20, 2  ;;  %p178_p2 = scmp.lt.s32.totalorder %s691_s17, 3 }
   0x7   : > { %s829_s20 = smov (%p31_p1, %s29_s20), 0  ;;  %p179_p3 = pnand %p543_p0, %p178_p2 }
   0x8   : > { %p208_p4 = scmp.eq.s32.totalorder (!%p179_p3), %s683_s15, 0 }
   0x9   : > { %182 = sbr.rel (%p179_p3) target bundleno = 714 (0x2ca), region = 36 }
  0x10   : > { %213 = sbr.rel (!%p208_p4) target bundleno = 23 (0x17), region = 40  ;;  %vm214_vm0 = vcmask (%p208_p4), 122880   ;;  %v693_v0 = vmov (%p208_p4), 0.0  }
  0x11   : > { %215 = vst.msk [vmem:[#allocation2] sm:$0x1] (%p208_p4), %vm214_vm0, %v693_v0  ;;  %216 = vst.msk [vmem:[#allocation3] sm:$0x1] (%p208_p4), %vm214_vm0, %v693_v0 }
  0x17 PF: > { %v218_v1 = vld [vmem:[%s821_s1] sm:$0xff]  ;;  %v219_v2 = vld [vmem:[%s821_s1 + $0x8] sm:$0xff]  ;;  %v220_v3 = vld [vmem:[%s821_s1 + $0x10] sm:$0xff]  ;;  %v694_v4 = vmov 0.0|0.0   ;;  %vm695_vm1 = vmmov 0   ;;  %v696_v7 = vmov 0.0  }
  0x18   : > { %581 = vmatprep.subr.bf16.mxu0 %v694_v4  ;;  %v582_v5 = vpack.c.bf16 %v219_v2, %v218_v1  ;;  %v221_v6 = vld [vmem:[%s821_s1 + $0x18] sm:$0xff]  ;;  %571 = vmatprep.mubr.msk.f32.mxu0 %vm695_vm1, %v696_v7  ;;  %v217_v9 = vld [vmem:[%s820_s0] sm:$0xff]  ;;  %vm222_vm2 = vcmask 261120   ;;  %p546_p5 = scmp.ne.s32.totalorder %s683_s15, 0 }
  0x19   : > { %v585_v8 = vpack.c.bf16 %v221_v6, %v220_v3  ;;  %vm307_vm3 = vcmask (!%p546_p5), 130048   ;;  %v306_v24 = vld [vmem:[#allocation2] sm:$0x1] (!%p546_p5)  ;;  %v318_v27 = vld [vmem:[#allocation3] sm:$0x1] (!%p546_p5)  ;;  %vm316_vm4 = vcmask (!%p546_p5), 122880  }
  0x1a   : > { %583 = vmatpush3.bf16.msra.mxu0 %v582_v5 }
  0x1b   : > { %584 = vmatprep.subr.bf16.mxu0 %v694_v4 }
  0x1e   : > { %586 = vmatpush3.bf16.msra.mxu0 %v585_v8 }
  0x21   : > { %572 = vmatmul.mubr.msk.f32.vlgmr.msra.gmra.mrb[0].mxu0 %vm222_vm2, %v217_v9 }
  0xef   : > { %298 = sbr.rel (%p546_p5) target bundleno = 263 (0x107), region = 44 }
  0xf4   : > { %v292_v10 = vpop.f32.mrb[0].mxu0 }
  0xf5   : > { %v573_v11 = vpop.f32.mrb[1].mxu0  ;;  %v319_v12 = vmul.f32 (!%p546_p5), %v292_v10, %v292_v10  ;;  %v308_v13 = vsel (!%p546_p5), %vm307_vm3, %v292_v10, 0.0 }
  0xf6   : > { %v309_v14 = vrot.slane %v308_v13, 4 }
  0xf7   : > { %v320_v15 = vsel %vm307_vm3, %v319_v12, 0.0 }
  0xf8   : > { %v321_v16 = vrot.slane %v320_v15, 4  ;;  %v310_v17 = vadd.f32 %v309_v14, %v308_v13 }
  0xfa   : > { %v322_v18 = vadd.f32 %v321_v16, %v320_v15  ;;  %v311_v19 = vrot.slane %v310_v17, 2 }
  0xfc   : > { %v323_v20 = vrot.slane %v322_v18, 2  ;;  %v312_v21 = vadd.f32 %v311_v19, %v310_v17 }
  0xfe   : > { %v324_v22 = vadd.f32 %v323_v20, %v322_v18  ;;  %v313_v23 = vrot.slane %v312_v21, 1 }
 0x100   : > { %v325_v25 = vrot.slane %v324_v22, 1  ;;  %v314_v26 = vadd.f32 %v313_v23, %v312_v21 }
 0x102   : > { %v326_v28 = vadd.f32 %v325_v25, %v324_v22  ;;  %v315_v29 = vadd.f32 %v314_v26, %v306_v24 }
 0x104   : > { %v327_v30 = vadd.f32 %v326_v28, %v318_v27  ;;  %317 = vst.msk [vmem:[#allocation2] sm:$0x1] %vm316_vm4, %v315_v29 }
 0x106   : > { %328 = vst.msk [vmem:[#allocation3] sm:$0x1] %vm316_vm4, %v327_v30 }
 0x107 PF: > { %p547_p6 = scmp.ne.s32.totalorder %s683_s15, 1 }
 0x108   : > { %v358_v31 = vld [vmem:[%s823_s3] sm:$0xff] (!%p547_p6)  ;;  %v359_v32 = vld [vmem:[%s823_s3 + $0x8] sm:$0xff] (!%p547_p6)  ;;  %v697_v33 = vmov (!%p547_p6), 0.0|0.0   ;;  %vm698_vm5 = vmmov (!%p547_p6), 0   ;;  %v699_v35 = vmov (!%p547_p6), 0.0   ;;  %v347_v44 = vlaneseq (!%p547_p6) }
 0x109   : > { %332 = sbr.rel (%p547_p6) target bundleno = 691 (0x2b3), region = 48  ;;  %587 = vmatprep.subr.bf16.mxu0 (!%p547_p6), %v697_v33  ;;  %v588_v34 = vpack.c.bf16 (!%p547_p6), %v359_v32, %v358_v31  ;;  %578 = vmatprep.mubr.msk.f32.mxu0 (!%p547_p6), %vm698_vm5, %v699_v35  ;;  %v340_v46 = vld [vmem:[%s822_s2] sm:$0x1] (!%p547_p6)  ;;  %v344_v50 = vld [vmem:[%s822_s2 + $0x1] sm:$0x1] (!%p547_p6)  ;;  %vm365_vm6 = vcmask (!%p547_p6), 130048  }
 0x10a   : > { %v348_v45 = vshrl.u32 (!%p547_p6), %v347_v44, 7  ;;  %v548_v58 = vld [vmem:[%s822_s2 + $0x2] ss:$0 sm:$0xff] (!%p547_p6) }
 0x10b   : > { %v333_v36 = vld [vmem:[#allocation2] sm:$0x1] (!%p547_p6)  ;;  %589 = vmatpush3.bf16.msra.mxu0 (!%p547_p6), %v588_v34 }
 0x10c   : > { %v334_v38 = vmul.f32 (!%p547_p6), 0.125, %v333_v36  ;;  %v349_v47 = vsub.s32 (!%p547_p6), 0, %v348_v45 }
 0x10d   : > { %v335_v37 = vld [vmem:[#allocation3] sm:$0x1] (!%p547_p6) }
 0x10e   : > { %v336_v39 = vmul.f32 (!%p547_p6), 0.125, %v335_v37  ;;  %v337_v40 = vmul.f32 (!%p547_p6), %v334_v38, %v334_v38 }
 0x110   : > { %v338_v41 = vsub.f32 %v336_v39, %v337_v40 }
 0x112   : > { %v339_v42 = vmax.f32 %v338_v41, 0.0 }
 0x114   : > { %v341_v43 = vadd.f32 0.001, %v339_v42 }
 0x116   : > { %633 = vrsqrt.f32 %v341_v43 }
 0x120   : > { %v634_v48 = vpop.eup %633 }
 0x121   : > { %v343_v49 = vmul.f32 %v634_v48, %v340_v46 }
 0x123   : > { %v345_v51 = vmul.f32 %v343_v49, %v334_v38  ;;  %v350_v52 = vrot.slane %v343_v49, %v349_v47 }
 0x125   : > { %v346_v53 = vsub.f32 %v344_v50, %v345_v51  ;;  %v351_v54 = vmul.f32 %v350_v52, %v292_v10 }
 0x127   : > { %v355_v55 = vrot.slane %v346_v53, %v349_v47 }
 0x129   : > { %v356_v56 = vadd.f32 %v355_v55, %v351_v54 }
 0x12b   : > { %v357_v57 = vmax.f32 %v356_v56, 0.0 }
 0x12d   : > { %579 = vmatmul.mubr.msk.f32.vlgmr.msra.gmra.mrb[0].mxu0 %vm365_vm6, %v357_v57 }
 0x200   : > { %v435_v59 = vpop.f32.mrb[0].mxu0 }
 0x201   : > { %v436_v60 = vadd.f32 %v548_v58, %v435_v59  ;;  %v580_v61 = vpop.f32.mrb[1].mxu0 }
 0x203   : > { %v439_v62 = vmul.f32 %v436_v60, %v436_v60 }
 0x205   : > { %v440_v63 = vsel %vm365_vm6, %v439_v62, 0.0 }
 0x206   : > { %441 = vadd.xlane.f32.xlu0 %v440_v63 }
 0x293   : > { %v442_v0 = vpop.xlane.xlu0 %441 }
 0x294   : > { %635 = vrsqrt.f32 %v442_v0  ;;  %vm445_vm7 = vcmp.eq.f32.partialorder %v442_v0, inf  ;;  %v448_v3 = vand.u32 2147483648, %v442_v0  ;;  %vm447_vm8 = vcmp.eq.f32.partialorder %v442_v0, 0.0 }
 0x29e   : > { %v636_v1 = vpop.eup %635 }
 0x29f   : > { %v444_v2 = vmul.f32 %v636_v1, %v442_v0 }
 0x2a1   : > { %v446_v4 = vsel %vm445_vm7, %v442_v0, %v444_v2 }
 0x2a2   : > { %v449_v5 = vsel %vm447_vm8, %v448_v3, %v446_v4 }
 0x2a3   : > { %v450_v6 = vadd.f32 1e-10, %v449_v5 }
 0x2a5   : > { %637 = vrcp.f32 %v450_v6 }
 0x2af   : > { %v638_v7 = vpop.eup %637 }
 0x2b0   : > { %v452_v8 = vmul.f32 %v638_v7, %v436_v60 }
 0x2b2   : > { %453 = vst.msk [vmem:[#allocation4] sm:$0xff] %vm365_vm6, %v452_v8 }
 0x2b3 PF: > { %p786_p7 = scmp.eq.s32.totalorder %s539_s18, 1  ;;  %s700_s21 = smov [#allocation4]  }
 0x2b4   : > { %s469_s22 = sshll.u32 %s700_s21, 4  ;;  %s470_s22 = int_to_ptr.vmem [resolvable:$true] %s469_s22 }
 0x2b5   : > { %s639_s23 = scalar_lea.vmem %s470_s22, 128  ;;  %s645_s24 = scalar_lea.vmem %s470_s22, 256 }
 0x2b6   : > { %p640_p8 = scmp.ne.s32.totalorder %s470_s22, %s639_s23  ;;  %p646_p11 = scmp.lt.s32.totalorder %s470_s22, %s470_s22 }
 0x2b7   : > { %p647_p12 = scmp.lt.s32.totalorder %s645_s24, %s639_s23 }
 0x2b8   : > { %p641_p9 = pnand %p640_p8, %p786_p7 }
 0x2b9   : > { %p648_p13 = por %p647_p12, %p646_p11 }
 0x2ba   : > { %p642_p10 = pneg %p641_p9 }
 0x2bc   : > { %p649_p0 = pnand %p648_p13, %p642_p10 }
 0x2be   : > { %652 = shalt.err (!%p649_p0)
}
 0x2bf   : > { %s653_s26 = scalar_lea.hbm %s824_s4, 128 }
 0x2c0   : > { %p654_p1 = scmp.ne.s32.totalorder %s824_s4, %s653_s26  ;;  %p659_p4 = scmp.lt.u32.totalorder %s653_s26, %s824_s4 }
 0x2c2   : > { %p655_p2 = pnand %p654_p1, %p786_p7 }
 0x2c4   : > { %p656_p3 = pneg %p655_p2 }
 0x2c6   : > { %p661_p5 = pnand %p659_p4, %p656_p3 }
 0x2c8   : > { %664 = shalt.err (!%p661_p5)
}
 0x2c9   : > { %591 = dma.vmem_to_hbm [thread:$0]  (%p786_p7), %s470_s22, 128, %s824_s4, [#allocation5]  }
 0x2ca PF: > { %p599_p6 = scmp.ge.s32.totalorder %s691_s17, 2  ;;  %p600_p8 = scmp.eq.s32.totalorder %s540_s19, 1 }
 0x2cc   : > { %p595_p9 = pnand %p600_p8, %p599_p6 }
 0x2ce   : > { %678 = dma.done.wait (!%p595_p9), [#allocation5], 128  }
 0x2cf   : > { %680 = vsyncadd (!%p595_p9), [#allocation5], 4294967168  ;;  %s17_s17 = sadd.s32 1, %s691_s17   ;;  %s826_s15 = smov %s687_s16 }
 0x2d0   : > { %p14_p10 = scmp.ge.s32.totalorder %s17_s17, 4   ;;  %s827_s16 = smov %s829_s20 }
 0x2d2   :  { %16 = sbr.rel (!%p14_p10) target bundleno = 3 (0x3), region = 83 }
 0x2d9   :  { %487 = vsyncpa [#allocation5], 1 }
 0x2da   :  { %489 = vsyncpa [#allocation5 + $0x1], 1 }

</bundles_post_ra>
